<compile_context>
chip_gen: v5e
topology: v5e:2x2
jax: 0.10.0
libtpu: 0.0.40
codegen_flags: <defaults>
</compile_context>

<pallas_src>
import functools

import jax
import jax.numpy as jnp
import numpy as np
from jax import lax
from jax.experimental import pallas as pl
from jax.experimental.pallas import tpu as pltpu

_NEG_BIG = -9e15      # same fill value as the PyTorch module
_ROW_TILE = 256       # max target rows per grid step
_COL_TILE = 512       # max neighbor columns per grid step


def _round_up(x, m):
    return ((x + m - 1) // m) * m


def _fused_homo_att_kernel(x_ref, w_ref, a1_ref, a2_ref, xt_ref, bias_ref,
                           out_ref, h_sc, m_sc, acc_sc, *, alpha, out_dim, tn):
    i = pl.program_id(0)            # target-row tile
    k = pl.program_id(1)            # neighbor-column tile (reduction axis, innermost)
    nk = pl.num_programs(1)
    cdtype = h_sc.dtype             # bf16 fast path or f32 exact path

    start = pl.multiple_of(k * tn, tn)

    # --- first row tile: produce this neighbor-column tile of h = X @ W once and keep it
    #     resident in VMEM scratch for all later row tiles.  A ones-column is planted at
    #     lane `out_dim` (inside the zero padding) so the aggregation matmul below also
    #     produces the softmax denominator for free (no cross-lane jnp.sum).
    @pl.when(i == 0)
    def _():
        h_t = jnp.dot(x_ref[pl.ds(start, tn), :], w_ref[...],
                      preferred_element_type=jnp.float32)
        lane = lax.broadcasted_iota(jnp.int32, h_t.shape, 1)
        h_sc[pl.ds(start, tn), :] = jnp.where(lane == out_dim, 1.0, h_t).astype(cdtype)

    # --- first column tile: reset the online-softmax carries for this row tile.
    @pl.when(k == 0)
    def _():
        m_sc[...] = jnp.full_like(m_sc, -jnp.inf)
        acc_sc[...] = jnp.zeros_like(acc_sc)

    h_tile = h_sc[pl.ds(start, tn), :]                            # [tn, out_pad]

    # e1[r] = h[target(r)] . a[:out_dim]  ==  X[target(r)] . (W @ a1)
    # (no dense one-hot selector matrix; xt_ref is only [tm, in_pad]).
    wa1 = jnp.dot(w_ref[...], a1_ref[...], preferred_element_type=jnp.float32)
    e1 = jnp.dot(xt_ref[...], wa1.astype(cdtype),
                 preferred_element_type=jnp.float32)              # [tm, 1]
    # e2[d] = h[d] . a[out_dim:], produced directly in row form (no transpose needed).
    e2 = lax.dot_general(a2_ref[...], h_tile, (((1,), (1,)), ((), ())),
                         preferred_element_type=jnp.float32)      # [1, tn]

    raw = e1 + e2                                                 # cat([h[s],h[d]],1) @ a
    leaky = jnp.where(raw > 0.0, raw, alpha * raw)                # LeakyReLU(alpha)
    att = leaky + bias_ref[...].astype(jnp.float32)               # additive -9e15 edge mask

    # Flash-style online softmax across neighbor-column tiles.
    m_prev = m_sc[...]
    m_new = jnp.maximum(m_prev, jnp.max(att, axis=-1, keepdims=True))
    rescale = jnp.exp(m_prev - m_new)                             # [tm, 1]
    p = jnp.exp(att - m_new)                                      # [tm, tn]
    acc_sc[...] = rescale * acc_sc[...] + jnp.dot(
        p.astype(cdtype), h_tile, preferred_element_type=jnp.float32)
    m_sc[...] = m_new

    # --- last column tile: normalize (denominator = the planted ones-column of acc),
    #     apply ELU(alpha=1), and write the lane-dense output block.
    @pl.when(k == nk - 1)
    def _():
        acc = acc_sc[...]
        denom = acc[:, out_dim:out_dim + 1]                       # sum of exp per row (>= 1)
        r = pl.reciprocal(denom, approx=True)                     # EUP slot
        r = r * (2.0 - denom * r)                                 # one Newton step -> f32 accuracy
        hp = acc * r
        # ELU(1).  min() keeps exp() finite in the discarded branch.
        # TODO(synk): use jnp.expm1 once its Mosaic lowering is guaranteed.
        out_ref[...] = jnp.where(hp > 0.0, hp,
                                 jnp.exp(jnp.minimum(hp, 0.0)) - 1.0).astype(out_ref.dtype)


@functools.partial(jax.jit,
                   static_argnames=("target_len", "neighbor_len", "alpha", "use_bf16"))
def homo_att_forward(features, W, a, adj, target_index_out, *,
                     target_len, neighbor_len, alpha, use_bf16=True):
    N, in_dim = features.shape
    out_dim = W.shape[1]
    assert neighbor_len == N, "attention @ h requires neighbor_len == num_nodes"
    cdtype = jnp.bfloat16 if use_bf16 else jnp.float32
    f32 = jnp.float32

    # (8,128)-aligned padded sizes.  out_pad reserves >=1 extra lane past out_dim for the
    # folded softmax-denominator column.
    in_pad = _round_up(in_dim, 128)
    out_pad = _round_up(out_dim + 1, 128)
    tn = min(_COL_TILE, _round_up(N, 128))
    n_pad = _round_up(N, tn)
    tm = min(_round_up(target_len, 8), _ROW_TILE)
    t_pad = _round_up(target_len, tm)

    x_p = jnp.zeros((n_pad, in_pad), cdtype).at[:N, :in_dim].set(features.astype(cdtype))
    w_p = jnp.zeros((in_pad, out_pad), cdtype).at[:in_dim, :out_dim].set(W.astype(cdtype))
    a1_p = jnp.zeros((out_pad, 1), cdtype).at[:out_dim, :].set(a[:out_dim].astype(cdtype))
    a2_p = jnp.zeros((1, out_pad), cdtype).at[:, :out_dim].set(
        a[out_dim:, 0][None, :].astype(cdtype))

    # Graph-structure tensors (for a static graph these can be precomputed/hoisted):
    #   tgt_nodes[r] = the source node (adj[0]) of output row r
    #   bias[r, d]   = 0 where (r -> d) is an edge, -9e15 elsewhere (additive mask)
    # Assumes all edges sharing a target_index_out row share the same adj[0] node.
    tgt_nodes = jnp.zeros((t_pad,), jnp.int32).at[target_index_out].set(adj[0])
    x_tgt = jnp.zeros((t_pad, in_pad), cdtype).at[:, :in_dim].set(
        features[tgt_nodes].astype(cdtype))
    mask = jnp.zeros((t_pad, n_pad), f32).at[target_index_out, adj[1]].set(1.0)
    bias = ((mask - 1.0) * (-_NEG_BIG)).astype(cdtype)

    grid = (t_pad // tm, n_pad // tn)
    out_p = pl.pallas_call(
        functools.partial(_fused_homo_att_kernel, alpha=alpha, out_dim=out_dim, tn=tn),
        grid=grid,
        in_specs=[
            # TODO(synk): grid-invariant blocks (X, W, a1, a2) are still double-buffered by
            # the default pipeline; pipeline_mode=pl.Buffered(1) would halve their VMEM.
            pl.BlockSpec((n_pad, in_pad), lambda i, k: (0, 0)),     # X (resident)
            pl.BlockSpec((in_pad, out_pad), lambda i, k: (0, 0)),   # W (resident)
            pl.BlockSpec((out_pad, 1), lambda i, k: (0, 0)),        # a[:out_dim] (column)
            pl.BlockSpec((1, out_pad), lambda i, k: (0, 0)),        # a[out_dim:] (row)
            pl.BlockSpec((tm, in_pad), lambda i, k: (i, 0)),        # X[target(row)]
            pl.BlockSpec((tm, tn), lambda i, k: (i, k)),            # additive edge bias
        ],
        out_specs=pl.BlockSpec((tm, out_pad), lambda i, k: (i, 0)),
        out_shape=jax.ShapeDtypeStruct((t_pad, out_pad), f32),
        scratch_shapes=[
            pltpu.VMEM((n_pad, out_pad), cdtype),   # h (+ ones column), resident
            pltpu.VMEM((tm, 1), f32),               # online-softmax running max
            pltpu.VMEM((tm, out_pad), f32),         # online-softmax accumulator
        ],
        # Both axes "arbitrary": the h scratch is filled on the first row tile and carried,
        # and the column axis is the online-softmax reduction.
        # TODO(synk): on v7x (2 TCs) split h production into its own pallas_call so the
        # row-tile axis can be marked "parallel".
        compiler_params=pltpu.CompilerParams(
            dimension_semantics=("arbitrary", "arbitrary"),
            vmem_limit_bytes=48 * 1024 * 1024),
    )(x_p, w_p, a1_p, a2_p, x_tgt, bias)

    # TODO(synk): F.dropout on the attention matrix is skipped (eval semantics).
    return out_p[:target_len, :out_dim]


def _reference(features, W, a, adj, target_index_out, target_len, neighbor_len, alpha):
    # Pure-JAX transliteration of the PyTorch forward (eval mode).
    h = features @ W
    compare = jnp.concatenate([h[adj[0]], h[adj[1]]], axis=1)
    e = (compare @ a)[:, 0]
    e = jnp.where(e > 0.0, e, alpha * e)
    att = jnp.full((target_len, neighbor_len), -9e15, dtype=jnp.float32)
    att = att.at[target_index_out, adj[1]].set(e)
    att = jax.nn.softmax(att, axis=1)
    hp = att @ h
    return jnp.where(hp > 0.0, hp, jnp.exp(hp) - 1.0)


def _xavier_uniform(key, shape, gain):
    fan_in, fan_out = shape[0], shape[1]
    bound = gain * np.sqrt(6.0 / (fan_in + fan_out))
    return jax.random.uniform(key, shape, jnp.float32, -bound, bound)


if __name__ == "__main__":
    key = jax.random.PRNGKey(0)
    N = 16            # number of nodes == neighbor_len
    in_dim = 8
    out_dim = 8
    target_len = 8
    alpha = 0.2
    deg = 4           # neighbors per target

    k1, k2, k3 = jax.random.split(key, 3)
    W = _xavier_uniform(k1, (in_dim, out_dim), 1.414)
    a = _xavier_uniform(k2, (2 * out_dim, 1), 1.414)
    features = jax.random.normal(k3, (N, in_dim), dtype=jnp.float32)

    # Deterministic edge list: target row t (node id t) connects to `deg` distinct neighbors.
    src, dst, rows = [], [], []
    for t in range(target_len):
        for j in range(deg):
            src.append(t)
            dst.append((t * 3 + j) % N)
            rows.append(t)
    adj = jnp.array([src, dst], dtype=jnp.int32)              # [2, E]
    target_index_out = jnp.array(rows, dtype=jnp.int32)       # [E]

    ref = _reference(features, W, a, adj, target_index_out, target_len, N, alpha)

    # Exact path (f32 operands): tight parity with the PyTorch semantics.
    out_f32 = homo_att_forward(features, W, a, adj, target_index_out,
                               target_len=target_len, neighbor_len=N, alpha=alpha,
                               use_bf16=False)
    out_f32 = jax.block_until_ready(out_f32)
    np.testing.assert_allclose(np.asarray(out_f32), np.asarray(ref), rtol=1e-5, atol=1e-5)

    # Fast path (bf16 MXU operands): looser tolerance, same semantics.
    out_bf16 = homo_att_forward(features, W, a, adj, target_index_out,
                                target_len=target_len, neighbor_len=N, alpha=alpha,
                                use_bf16=True)
    out_bf16 = jax.block_until_ready(out_bf16)
    np.testing.assert_allclose(np.asarray(out_bf16), np.asarray(ref), rtol=3e-2, atol=3e-2)

    print("KERNEL_OK")
</pallas_src>

<mosaic_0001>
module attributes {stable_mosaic.version = 11 : i64} {
  func.func @_fused_homo_att_kernel(%arg0: i32, %arg1: i32, %arg2: memref<128x128xf32, #tpu.memory_space<vmem>>, %arg3: memref<128x128xf32, #tpu.memory_space<vmem>>, %arg4: memref<128x1xf32, #tpu.memory_space<vmem>>, %arg5: memref<1x128xf32, #tpu.memory_space<vmem>>, %arg6: memref<8x128xf32, #tpu.memory_space<vmem>>, %arg7: memref<8x128xf32, #tpu.memory_space<vmem>>, %arg8: memref<8x128xf32, #tpu.memory_space<vmem>>, %arg9: memref<128x128xf32, #tpu.memory_space<vmem>>, %arg10: memref<8x1xf32, #tpu.memory_space<vmem>>, %arg11: memref<8x128xf32, #tpu.memory_space<vmem>>) attributes {dimension_semantics = [#tpu.dimension_semantics<arbitrary>, #tpu.dimension_semantics<arbitrary>], iteration_bounds = array<i64: 1, 1>, scalar_prefetch = 0 : i64, scratch_operands = 3 : i64, tpu.core_type = #tpu.core_type<tc>, window_params = [{pipeline_mode = #tpu.pipeline_mode<synchronous>, transform_indices = @transform_0, window_bounds = array<i64: 128, 128>}, {pipeline_mode = #tpu.pipeline_mode<synchronous>, transform_indices = @transform_1, window_bounds = array<i64: 128, 128>}, {pipeline_mode = #tpu.pipeline_mode<synchronous>, transform_indices = @transform_2, window_bounds = array<i64: 128, 1>}, {pipeline_mode = #tpu.pipeline_mode<synchronous>, transform_indices = @transform_3, window_bounds = array<i64: 1, 128>}, {transform_indices = @transform_4, window_bounds = array<i64: 8, 128>}, {transform_indices = @transform_5, window_bounds = array<i64: 8, 128>}, {transform_indices = @transform_6, window_bounds = array<i64: 8, 128>}]} {
    %c128_i32 = arith.constant 128 : i32
    %0 = arith.muli %arg1, %c128_i32 : i32
    %1 = tpu.assume_multiple %0, 128 : i32
    %c0_i32 = arith.constant 0 : i32
    %2 = arith.cmpi eq, %arg0, %c0_i32 : i32
    %3 = arith.extui %2 : i1 to i32
    %c0_i32_0 = arith.constant 0 : i32
    %4 = arith.cmpi ne, %3, %c0_i32_0 : i32
    scf.if %4 {
      %46 = arith.index_cast %1 : i32 to index
      %c0_29 = arith.constant 0 : index
      %47 = vector.load %arg2[%46, %c0_29] : memref<128x128xf32, #tpu.memory_space<vmem>>, vector<128x128xf32>
      %c0_30 = arith.constant 0 : index
      %c0_31 = arith.constant 0 : index
      %48 = vector.load %arg3[%c0_30, %c0_31] : memref<128x128xf32, #tpu.memory_space<vmem>>, vector<128x128xf32>
      %cst_32 = arith.constant dense<0.000000e+00> : vector<128x128xf32>
      %49 = tpu.matmul %47, %48, %cst_32 {dimension_numbers = #tpu.dot_dimension_numbers<[1], [0], [0], [1], [0, 0, 1, 1], [], []>} : vector<128x128xf32>, vector<128x128xf32>, vector<128x128xf32> -> vector<128x128xf32>
      %50 = tpu.iota {dimensions = array<i32: 1>} : vector<128x128xi32>
      %c8_i32 = arith.constant 8 : i32
      %51 = vector.broadcast %c8_i32 : i32 to vector<128x128xi32>
      %52 = arith.cmpi eq, %50, %51 : vector<128x128xi32>
      %cst_33 = arith.constant 1.000000e+00 : f32
      %53 = vector.broadcast %cst_33 : f32 to vector<128x128xf32>
      %54 = arith.select %52, %53, %49 : vector<128x128xi1>, vector<128x128xf32>
      %55 = arith.index_cast %1 : i32 to index
      %c0_34 = arith.constant 0 : index
      %56 = vector.load %arg9[%55, %c0_34] : memref<128x128xf32, #tpu.memory_space<vmem>>, vector<128x128xf32>
      tpu.vector_store %arg9[%55, %c0_34], %54 {strides = array<i32>} : memref<128x128xf32, #tpu.memory_space<vmem>>, vector<128x128xf32>,
    } else {
    }
    %c0_i32_1 = arith.constant 0 : i32
    %5 = arith.cmpi eq, %arg1, %c0_i32_1 : i32
    %6 = arith.extui %5 : i1 to i32
    %c0_i32_2 = arith.constant 0 : i32
    %7 = arith.cmpi ne, %6, %c0_i32_2 : i32
    scf.if %7 {
      %cst_29 = arith.constant 0xFF800000 : f32
      %46 = vector.broadcast %cst_29 : f32 to vector<8x1xf32>
      %c0_30 = arith.constant 0 : index
      %c0_31 = arith.constant 0 : index
      %47 = vector.load %arg10[%c0_30, %c0_31] : memref<8x1xf32, #tpu.memory_space<vmem>>, vector<8x1xf32>
      tpu.vector_store %arg10[%c0_30, %c0_31], %46 {strides = array<i32>} : memref<8x1xf32, #tpu.memory_space<vmem>>, vector<8x1xf32>,
      %cst_32 = arith.constant 0.000000e+00 : f32
      %48 = vector.broadcast %cst_32 : f32 to vector<8x128xf32>
      %c0_33 = arith.constant 0 : index
      %c0_34 = arith.constant 0 : index
      %49 = vector.load %arg11[%c0_33, %c0_34] : memref<8x128xf32, #tpu.memory_space<vmem>>, vector<8x128xf32>
      tpu.vector_store %arg11[%c0_33, %c0_34], %48 {strides = array<i32>} : memref<8x128xf32, #tpu.memory_space<vmem>>, vector<8x128xf32>,
    } else {
    }
    %8 = arith.index_cast %1 : i32 to index
    %c0 = arith.constant 0 : index
    %9 = vector.load %arg9[%8, %c0] : memref<128x128xf32, #tpu.memory_space<vmem>>, vector<128x128xf32>
    %c0_3 = arith.constant 0 : index
    %c0_4 = arith.constant 0 : index
    %10 = vector.load %arg3[%c0_3, %c0_4] : memref<128x128xf32, #tpu.memory_space<vmem>>, vector<128x128xf32>
    %c0_5 = arith.constant 0 : index
    %c0_6 = arith.constant 0 : index
    %11 = vector.load %arg4[%c0_5, %c0_6] : memref<128x1xf32, #tpu.memory_space<vmem>>, vector<128x1xf32>
    %cst = arith.constant dense<0.000000e+00> : vector<128x1xf32>
    %12 = tpu.matmul %10, %11, %cst {dimension_numbers = #tpu.dot_dimension_numbers<[1], [0], [0], [1], [0, 0, 1, 1], [], []>} : vector<128x128xf32>, vector<128x1xf32>, vector<128x1xf32> -> vector<128x1xf32>
    %c0_7 = arith.constant 0 : index
    %c0_8 = arith.constant 0 : index
    %13 = vector.load %arg6[%c0_7, %c0_8] : memref<8x128xf32, #tpu.memory_space<vmem>>, vector<8x128xf32>
    %cst_9 = arith.constant dense<0.000000e+00> : vector<8x1xf32>
    %14 = tpu.matmul %13, %12, %cst_9 {dimension_numbers = #tpu.dot_dimension_numbers<[1], [0], [0], [1], [0, 0, 1, 1], [], []>} : vector<8x128xf32>, vector<128x1xf32>, vector<8x1xf32> -> vector<8x1xf32>
    %c0_10 = arith.constant 0 : index
    %c0_11 = arith.constant 0 : index
    %15 = vector.load %arg5[%c0_10, %c0_11] : memref<1x128xf32, #tpu.memory_space<vmem>>, vector<1x128xf32>
    %cst_12 = arith.constant dense<0.000000e+00> : vector<1x128xf32>
    %16 = tpu.matmul %15, %9, %cst_12 {dimension_numbers = #tpu.dot_dimension_numbers<[1], [1], [0], [0], [0, 0, 1, 0], [], []>} : vector<1x128xf32>, vector<128x128xf32>, vector<1x128xf32> -> vector<1x128xf32>
    %17 = vector.broadcast %14 : vector<8x1xf32> to vector<8x128xf32>
    %18 = vector.broadcast %16 : vector<1x128xf32> to vector<8x128xf32>
    %19 = arith.addf %17, %18 : vector<8x128xf32>
    %cst_13 = arith.constant 0.000000e+00 : f32
    %20 = vector.broadcast %cst_13 : f32 to vector<8x128xf32>
    %21 = arith.cmpf ogt, %19, %20 : vector<8x128xf32>
    %cst_14 = arith.constant 2.000000e-01 : f32
    %22 = vector.broadcast %cst_14 : f32 to vector<8x128xf32>
    %23 = arith.mulf %22, %19 : vector<8x128xf32>
    %24 = arith.select %21, %19, %23 : vector<8x128xi1>, vector<8x128xf32>
    %c0_15 = arith.constant 0 : index
    %c0_16 = arith.constant 0 : index
    %25 = vector.load %arg7[%c0_15, %c0_16] : memref<8x128xf32, #tpu.memory_space<vmem>>, vector<8x128xf32>
    %26 = arith.addf %24, %25 : vector<8x128xf32>
    %c0_17 = arith.constant 0 : index
    %c0_18 = arith.constant 0 : index
    %27 = vector.load %arg10[%c0_17, %c0_18] : memref<8x1xf32, #tpu.memory_space<vmem>>, vector<8x1xf32>
    %cst_19 = arith.constant dense<0xFF800000> : vector<8xf32>
    %28 = vector.multi_reduction <maximumf>, %26, %cst_19 [1] : vector<8x128xf32> to vector<8xf32>
    %29 = vector.shape_cast %28 : vector<8xf32> to vector<8x1xf32>
    %30 = arith.maximumf %27, %29 : vector<8x1xf32>
    %31 = arith.subf %27, %30 : vector<8x1xf32>
    %32 = math.exp %31 : vector<8x1xf32>
    %33 = vector.broadcast %30 : vector<8x1xf32> to vector<8x128xf32>
    %34 = arith.subf %26, %33 : vector<8x128xf32>
    %35 = math.exp %34 : vector<8x128xf32>
    %c0_20 = arith.constant 0 : index
    %c0_21 = arith.constant 0 : index
    %36 = vector.load %arg11[%c0_20, %c0_21] : memref<8x128xf32, #tpu.memory_space<vmem>>, vector<8x128xf32>
    %37 = vector.broadcast %32 : vector<8x1xf32> to vector<8x128xf32>
    %38 = arith.mulf %37, %36 : vector<8x128xf32>
    %cst_22 = arith.constant dense<0.000000e+00> : vector<8x128xf32>
    %39 = tpu.matmul %35, %9, %cst_22 {dimension_numbers = #tpu.dot_dimension_numbers<[1], [0], [0], [1], [0, 0, 1, 1], [], []>} : vector<8x128xf32>, vector<128x128xf32>, vector<8x128xf32> -> vector<8x128xf32>
    %40 = arith.addf %38, %39 : vector<8x128xf32>
    %c0_23 = arith.constant 0 : index
    %c0_24 = arith.constant 0 : index
    %41 = vector.load %arg11[%c0_23, %c0_24] : memref<8x128xf32, #tpu.memory_space<vmem>>, vector<8x128xf32>
    tpu.vector_store %arg11[%c0_23, %c0_24], %40 {strides = array<i32>} : memref<8x128xf32, #tpu.memory_space<vmem>>, vector<8x128xf32>,
    %c0_25 = arith.constant 0 : index
    %c0_26 = arith.constant 0 : index
    %42 = vector.load %arg10[%c0_25, %c0_26] : memref<8x1xf32, #tpu.memory_space<vmem>>, vector<8x1xf32>
    tpu.vector_store %arg10[%c0_25, %c0_26], %30 {strides = array<i32>} : memref<8x1xf32, #tpu.memory_space<vmem>>, vector<8x1xf32>,
    %c0_i32_27 = arith.constant 0 : i32
    %43 = arith.cmpi eq, %arg1, %c0_i32_27 : i32
    %44 = arith.extui %43 : i1 to i32
    %c0_i32_28 = arith.constant 0 : i32
    %45 = arith.cmpi ne, %44, %c0_i32_28 : i32
    scf.if %45 {
      %c0_29 = arith.constant 0 : index
      %c0_30 = arith.constant 0 : index
      %46 = vector.load %arg11[%c0_29, %c0_30] : memref<8x128xf32, #tpu.memory_space<vmem>>, vector<8x128xf32>
      %47 = vector.extract_strided_slice %46 {offsets = [0, 8], sizes = [8, 1], strides = [1, 1]} : vector<8x128xf32> to vector<8x1xf32>
      %48 = tpu.reciprocal %47 {approx = true} : vector<8x1xf32> -> vector<8x1xf32>
      %49 = arith.mulf %47, %48 : vector<8x1xf32>
      %cst_31 = arith.constant 2.000000e+00 : f32
      %50 = vector.broadcast %cst_31 : f32 to vector<8x1xf32>
      %51 = arith.subf %50, %49 : vector<8x1xf32>
      %52 = arith.mulf %48, %51 : vector<8x1xf32>
      %53 = vector.broadcast %52 : vector<8x1xf32> to vector<8x128xf32>
      %54 = arith.mulf %46, %53 : vector<8x128xf32>
      %cst_32 = arith.constant 0.000000e+00 : f32
      %55 = vector.broadcast %cst_32 : f32 to vector<8x128xf32>
      %56 = arith.cmpf ogt, %54, %55 : vector<8x128xf32>
      %cst_33 = arith.constant 0.000000e+00 : f32
      %57 = vector.broadcast %cst_33 : f32 to vector<8x128xf32>
      %58 = arith.minimumf %54, %57 : vector<8x128xf32>
      %59 = math.exp %58 : vector<8x128xf32>
      %cst_34 = arith.constant 1.000000e+00 : f32
      %60 = vector.broadcast %cst_34 : f32 to vector<8x128xf32>
      %61 = arith.subf %59, %60 : vector<8x128xf32>
      %62 = arith.select %56, %54, %61 : vector<8x128xi1>, vector<8x128xf32>
      %c0_35 = arith.constant 0 : index
      %c0_36 = arith.constant 0 : index
      %63 = vector.load %arg8[%c0_35, %c0_36] : memref<8x128xf32, #tpu.memory_space<vmem>>, vector<8x128xf32>
      tpu.vector_store %arg8[%c0_35, %c0_36], %62 {strides = array<i32>} : memref<8x128xf32, #tpu.memory_space<vmem>>, vector<8x128xf32>,
    } else {
    }
    return
  }
  func.func @transform_0(%arg0: i32, %arg1: i32) -> (i32, i32) {
    %c0_i32 = arith.constant 0 : i32
    %c0_i32_0 = arith.constant 0 : i32
    %c0_i32_1 = arith.constant 0 : i32
    return %c0_i32, %c0_i32_0 : i32, i32
  }
  func.func @transform_1(%arg0: i32, %arg1: i32) -> (i32, i32) {
    %c0_i32 = arith.constant 0 : i32
    %c0_i32_0 = arith.constant 0 : i32
    %c0_i32_1 = arith.constant 0 : i32
    return %c0_i32, %c0_i32_0 : i32, i32
  }
  func.func @transform_2(%arg0: i32, %arg1: i32) -> (i32, i32) {
    %c0_i32 = arith.constant 0 : i32
    %c0_i32_0 = arith.constant 0 : i32
    %c0_i32_1 = arith.constant 0 : i32
    return %c0_i32, %c0_i32_0 : i32, i32
  }
  func.func @transform_3(%arg0: i32, %arg1: i32) -> (i32, i32) {
    %c0_i32 = arith.constant 0 : i32
    %c0_i32_0 = arith.constant 0 : i32
    %c0_i32_1 = arith.constant 0 : i32
    return %c0_i32, %c0_i32_0 : i32, i32
  }
  func.func @transform_4(%arg0: i32, %arg1: i32) -> (i32, i32) {
    %c0_i32 = arith.constant 0 : i32
    %c0_i32_0 = arith.constant 0 : i32
    return %arg0, %c0_i32 : i32, i32
  }
  func.func @transform_5(%arg0: i32, %arg1: i32) -> (i32, i32) {
    %c0_i32 = arith.constant 0 : i32
    return %arg0, %arg1 : i32, i32
  }
  func.func @transform_6(%arg0: i32, %arg1: i32) -> (i32, i32) {
    %c0_i32 = arith.constant 0 : i32
    %c0_i32_0 = arith.constant 0 : i32
    return %arg0, %c0_i32 : i32, i32
  }
}

</mosaic_0001>

<bundles_post_ra>
// kernel: homo_att_forward.1
= control target key start
LH: loop header
LB: loop body
LE: loop exit
PB: predicated region body
PF: predicated region fallthrough
CT: control target
= control target key end

     0   :  { %s771_s0 = inlined_call_operand.vmem [shape: f32[128,128], index: 0, kind: input, shape index: {}]   ;;  %s772_s1 = inlined_call_operand.vmem [shape: f32[128,128], index: 1, kind: input, shape index: {}]   ;;  %s773_s2 = inlined_call_operand.vmem [shape: f32[128,1], index: 2, kind: input, shape index: {}]   ;;  %s774_s3 = inlined_call_operand.vmem [shape: f32[1,128], index: 3, kind: input, shape index: {}]   ;;  %s775_s4 = inlined_call_operand.vmem [shape: f32[8,128], index: 4, kind: input, shape index: {}]   ;;  %s776_s5 = inlined_call_operand.vmem [shape: f32[8,128], index: 5, kind: input, shape index: {}]   ;;  %s777_s6 = inlined_call_operand.hbm [shape: f32[8,128], index: 6, kind: output, shape index: {}]  }
   0x1   :  { %v218_v0 = vld [vmem:[%s773_s2 + $0x78] sm:$0xff]  ;;  %v217_v1 = vld [vmem:[%s773_s2 + $0x70] sm:$0xff]  ;;  %v216_v2 = vld [vmem:[%s773_s2 + $0x68] sm:$0xff] }
   0x2   :  { %219 = vmatpush.msra.mxu1 %v218_v0  ;;  %v215_v3 = vld [vmem:[%s773_s2 + $0x60] sm:$0xff]  ;;  %v534_v4 = vld [vmem:[%s772_s1 + $0x78] sm:$0xff]  ;;  %v539_v5 = vld [vmem:[%s772_s1 + $0x70] sm:$0xff] }
   0x3   :  { %v214_v6 = vld [vmem:[%s773_s2 + $0x58] sm:$0xff]  ;;  %62 = vmatpush.msra.mxu0 %v534_v4  ;;  %422 = vmatpush.msra.mxu2 %v534_v4  ;;  %v549_v7 = vld [vmem:[%s772_s1 + $0x68] sm:$0xff]  ;;  %v213_v8 = vld [vmem:[%s773_s2 + $0x50] sm:$0xff] }
   0x4   :  { %220 = vmatpush.msra.mxu1 %v217_v1  ;;  %v559_v9 = vld [vmem:[%s772_s1 + $0x60] sm:$0xff]  ;;  %v212_v10 = vld [vmem:[%s773_s2 + $0x48] sm:$0xff] }
   0x5   :  { %63 = vmatpush.msra.mxu0 %v539_v5  ;;  %423 = vmatpush.msra.mxu2 %v539_v5 }
   0x6   :  { %221 = vmatpush.msra.mxu1 %v216_v2 }
   0x7   :  { %64 = vmatpush.msra.mxu0 %v549_v7  ;;  %424 = vmatpush.msra.mxu2 %v549_v7 }
   0x8   :  { %222 = vmatpush.msra.mxu1 %v215_v3 }
   0xa   :  { %223 = vmatpush.msra.mxu1 %v214_v6 }
   0xb   :  { %11 = vsyncpa [#allocation6], 0  ;;  %v569_v11 = vld [vmem:[%s772_s1 + $0x58] sm:$0xff]  ;;  %v211_v12 = vld [vmem:[%s773_s2 + $0x40] sm:$0xff]  ;;  %65 = vmatpush.msra.mxu0 %v559_v9  ;;  %425 = vmatpush.msra.mxu2 %v559_v9  ;;  %v127_v63 = vlaneseq  ;;  %vm167_vm1 = vcmask 7168   ;;  %s412_s23 = sshll.u32 %s777_s6, 4  ;;  %s413_s23 = int_to_ptr.hbm [resolvable:$true] %s412_s23 }
   0xc   :  { %224 = vmatpush.msra.mxu1 %v213_v8  ;;  %v579_v13 = vld [vmem:[%s772_s1 + $0x50] sm:$0xff]  ;;  %v210_v14 = vld [vmem:[%s773_s2 + $0x38] sm:$0xff]  ;;  %v589_v15 = vld [vmem:[%s772_s1 + $0x48] sm:$0xff] }
   0xd   :  { %66 = vmatpush.msra.mxu0 %v569_v11  ;;  %426 = vmatpush.msra.mxu2 %v569_v11  ;;  %v209_v16 = vld [vmem:[%s773_s2 + $0x30] sm:$0xff]  ;;  %v599_v17 = vld [vmem:[%s772_s1 + $0x40] sm:$0xff]  ;;  %v208_v18 = vld [vmem:[%s773_s2 + $0x28] sm:$0xff]  ;;  %v128_v1 = vand.u32 127, %v127_v63 }
   0xe   :  { %225 = vmatpush.msra.mxu1 %v212_v10  ;;  %v609_v19 = vld [vmem:[%s772_s1 + $0x38] sm:$0xff]  ;;  %v207_v20 = vld [vmem:[%s773_s2 + $0x20] sm:$0xff]  ;;  %v52_v21 = vld [vmem:[%s772_s1 + $0x30] sm:$0xff] }
   0xf   :  { %67 = vmatpush.msra.mxu0 %v579_v13  ;;  %427 = vmatpush.msra.mxu2 %v579_v13  ;;  %v206_v22 = vld [vmem:[%s773_s2 + $0x18] sm:$0xff]  ;;  %v51_v23 = vld [vmem:[%s772_s1 + $0x28] sm:$0xff]  ;;  %v205_v24 = vld [vmem:[%s773_s2 + $0x10] sm:$0xff]  ;;  %vm129_vm0 = vcmp.eq.s32.totalorder %v128_v1, 8 }
  0x10   :  { %226 = vmatpush.msra.mxu1 %v211_v12  ;;  %v50_v25 = vld [vmem:[%s772_s1 + $0x20] sm:$0xff]  ;;  %v204_v26 = vld [vmem:[%s773_s2 + $0x8] sm:$0xff]  ;;  %v49_v27 = vld [vmem:[%s772_s1 + $0x18] sm:$0xff] }
  0x11   :  { %68 = vmatpush.msra.mxu0 %v589_v15  ;;  %428 = vmatpush.msra.mxu2 %v589_v15  ;;  %v203_v28 = vld [vmem:[%s773_s2] sm:$0xff]  ;;  %v189_v30 = vld [vmem:[%s772_s1 + $0x10] sm:$0xff]  ;;  %v188_v31 = vld [vmem:[%s772_s1 + $0x8] sm:$0xff] }
  0x12   :  { %227 = vmatpush.msra.mxu1 %v210_v14  ;;  %v187_v29 = vld [vmem:[%s772_s1] sm:$0xff]  ;;  %v41_v33 = vld [vmem:[%s771_s0 + $0x58] sm:$0xff]  ;;  %v31_v34 = vld [vmem:[%s771_s0 + $0x8] sm:$0xff] }
  0x13   :  { %69 = vmatpush.msra.mxu0 %v599_v17  ;;  %429 = vmatpush.msra.mxu2 %v599_v17  ;;  %v30_v32 = vld [vmem:[%s771_s0] sm:$0xff]  ;;  %v32_v36 = vld [vmem:[%s771_s0 + $0x10] sm:$0xff]  ;;  %v43_v37 = vld [vmem:[%s771_s0 + $0x68] sm:$0xff] }
  0x14   :  { %228 = vmatpush.msra.mxu1 %v209_v16  ;;  %v42_v35 = vld [vmem:[%s771_s0 + $0x60] sm:$0xff]  ;;  %v33_v38 = vld [vmem:[%s771_s0 + $0x18] sm:$0xff]  ;;  %v44_v39 = vld [vmem:[%s771_s0 + $0x70] sm:$0xff] }
  0x15   :  { %70 = vmatpush.msra.mxu0 %v609_v19  ;;  %430 = vmatpush.msra.mxu2 %v609_v19  ;;  %v34_v40 = vld [vmem:[%s771_s0 + $0x20] sm:$0xff]  ;;  %v45_v41 = vld [vmem:[%s771_s0 + $0x78] sm:$0xff]  ;;  %v35_v42 = vld [vmem:[%s771_s0 + $0x28] sm:$0xff] }
  0x16   :  { %229 = vmatpush.msra.mxu1 %v208_v18  ;;  %v36_v43 = vld [vmem:[%s771_s0 + $0x30] sm:$0xff]  ;;  %v37_v44 = vld [vmem:[%s771_s0 + $0x38] sm:$0xff]  ;;  %v38_v45 = vld [vmem:[%s771_s0 + $0x40] sm:$0xff] }
  0x17   :  { %71 = vmatpush.msra.mxu0 %v52_v21  ;;  %431 = vmatpush.msra.mxu2 %v52_v21  ;;  %v39_v46 = vld [vmem:[%s771_s0 + $0x48] sm:$0xff]  ;;  %v40_v47 = vld [vmem:[%s771_s0 + $0x50] sm:$0xff] }
  0x18   :  { %230 = vmatpush.msra.mxu1 %v207_v20 }
  0x19   :  { %72 = vmatpush.msra.mxu0 %v51_v23  ;;  %432 = vmatpush.msra.mxu2 %v51_v23 }
  0x1a   :  { %231 = vmatpush.msra.mxu1 %v206_v22 }
  0x1b   :  { %73 = vmatpush.msra.mxu0 %v50_v25  ;;  %433 = vmatpush.msra.mxu2 %v50_v25 }
  0x1c   :  { %232 = vmatpush.msra.mxu1 %v205_v24 }
  0x1d   :  { %74 = vmatpush.msra.mxu0 %v49_v27  ;;  %434 = vmatpush.msra.mxu2 %v49_v27 }
  0x1e   :  { %233 = vmatpush.msra.mxu1 %v204_v26 }
  0x1f   :  { %75 = vmatpush.msra.mxu0 %v189_v30  ;;  %435 = vmatpush.msra.mxu2 %v189_v30 }
  0x20   :  { %234 = vmatpush.msra.mxu1 %v203_v28 }
  0x21   :  { %235 = vmatmul.f32.vlgmr.msra.gmra.mxu1 %v187_v29  ;;  %76 = vmatpush.msra.mxu0 %v188_v31 }
  0x22   :  { %436 = vmatpush.msra.mxu2 %v188_v31 }
  0x23   :  { %77 = vmatpush.msra.mxu0 %v187_v29 }
  0x24   :  { %78 = vmatmul.f32.vlgmr.msra.gmra.mxu0 %v30_v32  ;;  %437 = vmatpush.msra.mxu2 %v187_v29 }
  0x25   :  { %111 = vmatmul.f32.vlgmr.msra.gmra.mxu2 %v41_v33 }
  0x29   :  { %238 = vmatmul.f32.gmra.mxu1 %v188_v31 }
  0x2c   :  { %81 = vmatmul.f32.gmra.mxu0 %v31_v34  ;;  %v284_v34 = vld [vmem:[%s775_s4] sm:$0xff] }
  0x2d   :  { %114 = vmatmul.f32.gmra.mxu2 %v42_v35  ;;  %v305_v35 = vld [vmem:[%s774_s3] sm:$0x1] }
  0x31   :  { %241 = vmatmul.f32.gmra.mxu1 %v189_v30 }
  0x34   :  { %84 = vmatmul.f32.gmra.mxu0 %v32_v36  ;;  %v480_v36 = vmov 0  }
  0x35   :  { %117 = vmatmul.f32.gmra.mxu2 %v43_v37  ;;  %442 = vset.pattern.permute.xlu0 %v480_v36 }
  0x36   :  { %443 = vset.pattern.permute.xlu1 %v480_v36 }
  0x39   :  { %244 = vmatmul.f32.gmra.mxu1 %v49_v27 }
  0x3c   :  { %87 = vmatmul.f32.gmra.mxu0 %v33_v38  ;;  %v481_v38 = vmov -inf  }
  0x3d   :  { %120 = vmatmul.f32.gmra.mxu2 %v44_v39  ;;  %168 = vst.msk [vmem:[#allocation3] sm:$0xff] %vm167_vm1, %v481_v38 }
  0x41   :  { %247 = vmatmul.f32.gmra.mxu1 %v50_v25 }
  0x44   :  { %90 = vmatmul.f32.gmra.mxu0 %v34_v40 }
  0x45   :  { %123 = vmatmul.f32.gmra.mxu2 %v45_v41 }
  0x49   :  { %250 = vmatmul.f32.gmra.mxu1 %v51_v23 }
  0x4c   :  { %93 = vmatmul.f32.gmra.mxu0 %v35_v42 }
  0x51   :  { %253 = vmatmul.f32.gmra.mxu1 %v52_v21 }
  0x54   :  { %96 = vmatmul.f32.gmra.mxu0 %v36_v43 }
  0x59   :  { %256 = vmatmul.f32.gmra.mxu1 %v609_v19 }
  0x5c   :  { %99 = vmatmul.f32.gmra.mxu0 %v37_v44  ;;  %v336_v44 = vld [vmem:[%s776_s5] sm:$0xff]  ;;  %s483_s5 = smov [#allocation5]  }
  0x5d   :  { %s410_s20 = sshll.u32 %s483_s5, 4  ;;  %s411_s20 = int_to_ptr.vmem [resolvable:$true] %s410_s20 }
  0x61   :  { %259 = vmatmul.f32.gmra.mxu1 %v599_v17 }
  0x64   :  { %102 = vmatmul.f32.gmra.mxu0 %v38_v45 }
  0x69   :  { %262 = vmatmul.f32.gmra.mxu1 %v589_v15 }
  0x6c   :  { %105 = vmatmul.f32.gmra.mxu0 %v39_v46 }
  0x71   :  { %265 = vmatmul.f32.gmra.mxu1 %v579_v13 }
  0x74   :  { %108 = vmatmul.f32.gmra.mxu0 %v40_v47  ;;  %v338_v47 = vld [vmem:[#allocation3] sm:$0xff] }
  0x79   :  { %268 = vmatmul.f32.gmra.mxu1 %v569_v11 }
  0x81   :  { %271 = vmatmul.f32.gmra.mxu1 %v559_v9 }
  0x89   :  { %274 = vmatmul.f32.gmra.mxu1 %v549_v7 }
  0x91   :  { %277 = vmatmul.f32.gmra.mxu1 %v539_v5 }
  0x99   :  { %280 = vmatmul.f32.gmra.mxu1 %v534_v4 }
  0x9e   :  { %v708_v48 = vpop.f32.mrf.mxu1 }
  0xa1   :  { %v710_v49 = vpop.f32.mrf.mxu0 }
  0xa2   :  { %v130_v33 = vsel %vm129_vm0, 1.0, %v710_v49 }
  0xa6   :  { %v712_v50 = vpop.f32.mrf.mxu1 }
  0xa8   :  { %v112_v53 = vpop.f32.mrf.mxu2 }
  0xa9   :  { %v82_v51 = vpop.f32.mrf.mxu0  ;;  %v141_v12 = vsel %vm129_vm0, 1.0, %v112_v53 }
  0xaa   :  { %v131_v32 = vsel %vm129_vm0, 1.0, %v82_v51 }
  0xae   :  { %v714_v52 = vpop.f32.mrf.mxu1 }
  0xb0   :  { %v115_v56 = vpop.f32.mrf.mxu2 }
  0xb1   :  { %v85_v54 = vpop.f32.mrf.mxu0  ;;  %v142_v10 = vsel %vm129_vm0, 1.0, %v115_v56 }
  0xb2   :  { %v132_v30 = vsel %vm129_vm0, 1.0, %v85_v54 }
  0xb6   :  { %v716_v55 = vpop.f32.mrf.mxu1 }
  0xb8   :  { %v118_v59 = vpop.f32.mrf.mxu2 }
  0xb9   :  { %v88_v57 = vpop.f32.mrf.mxu0  ;;  %v731_v8 = vsel %vm129_vm0, 1.0, %v118_v59 }
  0xba   :  { %v133_v24 = vsel %vm129_vm0, 1.0, %v88_v57  ;;  %v482_v57 = vmov 8  }
  0xbb   :  { %444 = vset.pattern.permute.xlu2 %v482_v57 }
  0xbe   :  { %v718_v58 = vpop.f32.mrf.mxu1 }
  0xc0   :  { %v121_v62 = vpop.f32.mrf.mxu2 }
  0xc1   :  { %v91_v60 = vpop.f32.mrf.mxu0  ;;  %v727_v6 = vsel %vm129_vm0, 1.0, %v121_v62 }
  0xc2   :  { %v134_v28 = vsel %vm129_vm0, 1.0, %v91_v60 }
  0xc6   :  { %v720_v61 = vpop.f32.mrf.mxu1 }
  0xc8   :  { %v124_v3 = vpop.f32.mrf.mxu2 }
  0xc9   :  { %v94_v0 = vpop.f32.mrf.mxu0  ;;  %v723_v4 = vsel %vm129_vm0, 1.0, %v124_v3 }
  0xca   :  { %306 = vmatpush.xpose.msra.mxu3 %v723_v4  ;;  %v135_v27 = vsel %vm129_vm0, 1.0, %v94_v0 }
  0xce   :  { %v254_v2 = vpop.f32.mrf.mxu1  ;;  %307 = vmatpush.xpose.msra.mxu3 %v727_v6 }
  0xd1   :  { %v97_v5 = vpop.f32.mrf.mxu0 }
  0xd2   :  { %308 = vmatpush.xpose.msra.mxu3 %v731_v8  ;;  %v136_v25 = vsel %vm129_vm0, 1.0, %v97_v5 }
  0xd6   :  { %v257_v7 = vpop.f32.mrf.mxu1  ;;  %309 = vmatpush.xpose.msra.mxu3 %v142_v10 }
  0xd9   :  { %v100_v9 = vpop.f32.mrf.mxu0 }
  0xda   :  { %310 = vmatpush.xpose.msra.mxu3 %v141_v12  ;;  %v137_v23 = vsel %vm129_vm0, 1.0, %v100_v9 }
  0xde   :  { %v260_v11 = vpop.f32.mrf.mxu1 }
  0xe1   :  { %v103_v13 = vpop.f32.mrf.mxu0 }
  0xe2   :  { %v138_v21 = vsel %vm129_vm0, 1.0, %v103_v13 }
  0xe6   :  { %v263_v14 = vpop.f32.mrf.mxu1 }
  0xe9   :  { %v106_v15 = vpop.f32.mrf.mxu0 }
  0xea   :  { %v139_v20 = vsel %vm129_vm0, 1.0, %v106_v15 }
  0xee   :  { %v266_v16 = vpop.f32.mrf.mxu1 }
  0xf1   :  { %v109_v17 = vpop.f32.mrf.mxu0 }
  0xf2   :  { %v140_v18 = vsel %vm129_vm0, 1.0, %v109_v17 }
  0xf3   :  { %311 = vmatpush.xpose.msra.mxu3 %v140_v18 }
  0xf6   :  { %v269_v19 = vpop.f32.mrf.mxu1 }
  0xf7   :  { %312 = vmatpush.xpose.msra.mxu3 %v139_v20 }
  0xfb   :  { %313 = vmatpush.xpose.msra.mxu3 %v138_v21 }
  0xfe   :  { %v272_v22 = vpop.f32.mrf.mxu1 }
  0xff   :  { %314 = vmatpush.xpose.msra.mxu3 %v137_v23 }
 0x103   :  { %315 = vmatpush.xpose.msra.mxu3 %v136_v25 }
 0x106   :  { %v275_v26 = vpop.f32.mrf.mxu1 }
 0x107   :  { %316 = vmatpush.xpose.msra.mxu3 %v135_v27 }
 0x10b   :  { %317 = vmatpush.xpose.msra.mxu3 %v134_v28 }
 0x10e   :  { %v278_v29 = vpop.f32.mrf.mxu1 }
 0x10f   :  { %318 = vmatpush.xpose.msra.mxu3 %v133_v24 }
 0x113   :  { %319 = vmatpush.xpose.msra.mxu3 %v132_v30 }
 0x116   :  { %v281_v31 = vpop.f32.mrf.mxu1 }
 0x117   :  { %285 = vmatpush.msrb.mxu2 %v281_v31  ;;  %320 = vmatpush.xpose.msra.mxu3 %v131_v32 }
 0x119   :  { %286 = vmatpush.msrb.mxu2 %v278_v29 }
 0x11b   :  { %287 = vmatpush.msrb.mxu2 %v275_v26  ;;  %321 = vmatpush.xpose.msra.mxu3 %v130_v33 }
 0x11d   :  { %288 = vmatpush.msrb.mxu2 %v272_v22 }
 0x11e   :  { %322 = vmatmul.f32.vlgmr.msra.gmra.mxu3 %v305_v35 }
 0x11f   :  { %289 = vmatpush.msrb.mxu2 %v269_v19 }
 0x121   :  { %290 = vmatpush.msrb.mxu2 %v266_v16 }
 0x123   :  { %291 = vmatpush.msrb.mxu2 %v263_v14 }
 0x125   :  { %292 = vmatpush.msrb.mxu2 %v260_v11 }
 0x127   :  { %293 = vmatpush.msrb.mxu2 %v257_v7 }
 0x129   :  { %294 = vmatpush.msrb.mxu2 %v254_v2 }
 0x12b   :  { %295 = vmatpush.msrb.mxu2 %v720_v61 }
 0x12d   :  { %296 = vmatpush.msrb.mxu2 %v718_v58 }
 0x12f   :  { %297 = vmatpush.msrb.mxu2 %v716_v55 }
 0x131   :  { %298 = vmatpush.msrb.mxu2 %v714_v52 }
 0x133   :  { %299 = vmatpush.msrb.mxu2 %v712_v50 }
 0x135   :  { %300 = vmatpush.msrb.mxu2 %v708_v48 }
 0x136   :  { %301 = vmatmul.f32.vlgmr.msrb.gmra.mxu2 %v284_v34 }
 0x137   :  { %360 = vmatpush.msra.mxu2 %v723_v4 }
 0x139   :  { %361 = vmatpush.msra.mxu2 %v727_v6 }
 0x13b   :  { %362 = vmatpush.msra.mxu2 %v731_v8 }
 0x13d   :  { %363 = vmatpush.msra.mxu2 %v142_v10 }
 0x13f   :  { %364 = vmatpush.msra.mxu2 %v141_v12 }
 0x141   :  { %365 = vmatpush.msra.mxu2 %v140_v18 }
 0x143   :  { %366 = vmatpush.msra.mxu2 %v139_v20 }
 0x145   :  { %367 = vmatpush.msra.mxu2 %v138_v21 }
 0x147   :  { %368 = vmatpush.msra.mxu2 %v137_v23 }
 0x149   :  { %369 = vmatpush.msra.mxu2 %v136_v25 }
 0x14b   :  { %370 = vmatpush.msra.mxu2 %v135_v27 }
 0x14d   :  { %371 = vmatpush.msra.mxu2 %v134_v28 }
 0x14f   :  { %372 = vmatpush.msra.mxu2 %v133_v24 }
 0x151   :  { %373 = vmatpush.msra.mxu2 %v132_v30 }
 0x153   :  { %374 = vmatpush.msra.mxu2 %v131_v32 }
 0x155   :  { %375 = vmatpush.msra.mxu2 %v130_v33 }
 0x1a1   :  { %v323_v39 = vpop.f32.mrf.mxu3 }
 0x1a2   :  { %v331_v40 = vperm.slane %v323_v39, 0 }
 0x1b9   :  { %v302_v37 = vpop.f32.mrf.mxu2 }
 0x1ba   :  { %328 = vperm.xlu0 %442, %v302_v37  }
 0x1c2   :  { %445 = vset.pattern.permute.xlu0 %v482_v57 }
 0x22c   :  { %v329_v41 = vpop.permute.xlu0 %328 }
 0x22d   :  { %v332_v42 = vadd.f32 %v331_v40, %v329_v41 }
 0x22f   :  { %v334_v43 = vmul.f32 0.2, %v332_v42  ;;  %vm333_vm2 = vcmp.gt.f32.partialorder %v332_v42, 0.0 }
 0x231   :  { %v335_v45 = vsel %vm333_vm2, %v332_v42, %v334_v43 }
 0x232   :  { %v337_v46 = vadd.f32 %v336_v44, %v335_v45 }
 0x234   :  { %339 = vmax.xlane.f32.xlu0 %v337_v46 }
 0x2a7   :  { %v340_v48 = vpop.xlane.xlu0 %339 }
 0x2a8   :  { %v341_v49 = vmax.f32 %v338_v47, %v340_v48 }
 0x2aa   :  { %v342_v50 = vsub.f32 %v338_v47, %v341_v49  ;;  %383 = vst.msk [vmem:[#allocation3] sm:$0xff] %vm167_vm1, %v341_v49  ;;  %347 = vperm.xlu1 %443, %v341_v49  }
 0x2ac   :  { %v343_v51 = vmul.f32 1.442695, %v342_v50 }
 0x2ae   :  { %446 = vpow2.f32 %v343_v51 }
 0x2b4   :  { %v447_v52 = vpop.eup %446 }
 0x2b5   :  { %356 = vperm.xlu1 %443, %v447_v52  }
 0x31c   :  { %v348_v53 = vpop.permute.xlu1 %347 }
 0x31d   :  { %v350_v54 = vsub.f32 %v337_v46, %v348_v53 }
 0x31f   :  { %v351_v55 = vmul.f32 1.442695, %v350_v54 }
 0x321   :  { %448 = vpow2.f32 %v351_v55 }
 0x327   :  { %v449_v56 = vpop.eup %448  ;;  %v357_v58 = vpop.permute.xlu1 %356 }
 0x328   :  { %376 = vmatmul.f32.vlgmr.msra.gmra.mxu2 %v449_v56  ;;  %v359_v59 = vmul.f32 0.0, %v357_v58 }
 0x3ab   :  { %v377_v60 = vpop.f32.mrf.mxu2 }
 0x3ac   :  { %v380_v61 = vadd.f32 %v377_v60, %v359_v59 }
 0x3ae   :  { %450 = vrcp.f32 %v380_v61 }
 0x3b4   :  { %v451_v62 = vpop.eup %450 }
 0x3b5   :  { %v389_v63 = vmul.f32 %v451_v62, %v380_v61 }
 0x3b7   :  { %v390_v0 = vsub.f32 2.0, %v389_v63 }
 0x3b9   :  { %v391_v1 = vmul.f32 %v451_v62, %v390_v0 }
 0x3bb   :  { %394 = vperm.xlu2 %444, %v391_v1  }
 0x415   :  { %v395_v2 = vpop.permute.xlu2 %394 }
 0x416   :  { %v397_v3 = vmul.f32 %v395_v2, %v380_v61 }
 0x418   :  { %v399_v4 = vmin.f32 %v397_v3, 0.0  ;;  %vm398_vm3 = vcmp.gt.f32.partialorder %v397_v3, 0.0 }
 0x41a   :  { %v400_v5 = vmul.f32 1.442695, %v399_v4 }
 0x41c   :  { %452 = vpow2.f32 %v400_v5 }
 0x422   :  { %v453_v6 = vpop.eup %452 }
 0x423   :  { %v421_v7 = vadd.f32 -1.0, %v453_v6 }
 0x425   :  { %v403_v8 = vsel %vm398_vm3, %v397_v3, %v421_v7 }
 0x426   :  { %404 = vst [vmem:[#allocation5] sm:$0xff] %v403_v8 }
 0x427   :  { %415 = dma.vmem_to_hbm [thread:$0]  %s411_s20, 128, %s413_s23, [#allocation6]  }
 0x428   :  { %478 = dma.done.wait [#allocation6], 128  }
 0x429   :  { %479 = vsyncadd [#allocation6], 4294967168 }
 0x42a   :  { %420 = vsyncpa [#allocation6], 1 }

</bundles_post_ra>
